<compile_context>
chip_gen: v6e
topology: v6e:2x2x1
jax: 0.10.0
libtpu: 0.0.40
codegen_flags: <defaults>
</compile_context>

<pallas_src>
import functools

import jax
import jax.numpy as jnp
from jax.experimental import pallas as pl
from jax.experimental.pallas import tpu as pltpu


def _sigmoid_f32(x):
    # Plain exp + divide: lowers cleanly on TPU and in interpret mode.
    # (On real TPU, pl.reciprocal(1+exp(-x), approx=True) routes the divide
    # to the EUP slot; kept portable here.)
    return 1.0 / (1.0 + jnp.exp(-x))


def _rbm_kernel(v_ref, w_ref, wt_ref, vb_ref, hb_ref, uh_ref, uv_ref,
                vk_ref, hk_ref, *, k):
    v = v_ref[...].astype(jnp.float32)        # (TB, n_vis)
    W = w_ref[...]                            # (n_hid, n_vis), bf16
    Wt = wt_ref[...]                          # (n_vis, n_hid), bf16
    vb = vb_ref[...].astype(jnp.float32)      # (1, n_vis)
    hb = hb_ref[...].astype(jnp.float32)      # (1, n_hid)

    def sample(p, u):
        # torch: relu(sign(p - rand)) == 1.0 where p > u else 0.0
        return jnp.where(p > u, 1.0, 0.0)

    def v_to_h(vis, u):
        # F.linear(v, W, h_bias) = v @ W.T + h_bias  (use pre-transposed Wt)
        pre = jnp.dot(vis.astype(jnp.bfloat16), Wt,
                      preferred_element_type=jnp.float32) + hb
        return sample(_sigmoid_f32(pre), u)

    def h_to_v(hid, u):
        # F.linear(h, W.t(), v_bias) = h @ W + v_bias
        pre = jnp.dot(hid.astype(jnp.bfloat16), W,
                      preferred_element_type=jnp.float32) + vb
        return sample(_sigmoid_f32(pre), u)

    # forward(): h1 = sample(v_to_h(v)); then k Gibbs steps (k >= 1).
    h_ = v_to_h(v, uh_ref[0])
    v_ = v
    for step in range(k):
        v_ = h_to_v(h_, uv_ref[step])
        h_ = v_to_h(v_, uh_ref[step + 1])

    vk_ref[...] = v_.astype(vk_ref.dtype)
    hk_ref[...] = h_.astype(hk_ref.dtype)


def rbm_forward(v, W, v_bias, h_bias, u_h, u_v, *, tb=256):
    """Returns (v, v_k, h_k) matching RBM.forward semantics.

    u_h: (k+1, B, n_hid) uniforms for the hidden-unit samples.
    u_v: (k,   B, n_vis) uniforms for the visible-unit samples.
    """
    B, n_vis = v.shape
    n_hid = W.shape[0]
    k = u_v.shape[0]
    assert k >= 1, "RBM forward requires k >= 1 Gibbs steps"
    assert u_h.shape == (k + 1, B, n_hid)
    assert u_v.shape == (k, B, n_vis)

    # Batch tile: biggest that divides B, capped at `tb`.
    TB = tb if (B % tb == 0) else B
    grid = (B // TB,)

    # Ship W as bf16 (halves HBM traffic); pre-transpose once on the host.
    W_bf = W.astype(jnp.bfloat16)
    Wt_bf = W_bf.T
    vb2 = v_bias.reshape(1, n_vis).astype(jnp.float32)
    hb2 = h_bias.reshape(1, n_hid).astype(jnp.float32)
    v_f32 = v.astype(jnp.float32)
    u_h = u_h.astype(jnp.float32)
    u_v = u_v.astype(jnp.float32)

    kernel = functools.partial(_rbm_kernel, k=k)

    v_k, h_k = pl.pallas_call(
        kernel,
        out_shape=(
            jax.ShapeDtypeStruct((B, n_vis), jnp.float32),   # v_ after k steps
            jax.ShapeDtypeStruct((B, n_hid), jnp.float32),   # h_ after k steps
        ),
        grid=grid,
        in_specs=[
            pl.BlockSpec((TB, n_vis), lambda i: (i, 0)),          # v (batch tiles)
            pl.BlockSpec((n_hid, n_vis), lambda i: (0, 0)),       # W   (resident)
            pl.BlockSpec((n_vis, n_hid), lambda i: (0, 0)),       # W^T (resident)
            pl.BlockSpec((1, n_vis), lambda i: (0, 0)),           # v_bias
            pl.BlockSpec((1, n_hid), lambda i: (0, 0)),           # h_bias
            pl.BlockSpec((k + 1, TB, n_hid), lambda i: (0, i, 0)),  # u_h
            pl.BlockSpec((k, TB, n_vis), lambda i: (0, i, 0)),      # u_v
        ],
        out_specs=(
            pl.BlockSpec((TB, n_vis), lambda i: (i, 0)),
            pl.BlockSpec((TB, n_hid), lambda i: (i, 0)),
        ),
        compiler_params=pltpu.CompilerParams(
            dimension_semantics=("parallel",)),
    )(v_f32, W_bf, Wt_bf, vb2, hb2, u_h, u_v)

    # Pass-through of the input (no kernel writeback needed).
    return v, v_k, h_k


def _rbm_reference(v, W, v_bias, h_bias, u_h, u_v):
    """Pure-JAX reference with the same bf16-operand / f32-accum matmuls."""
    W_bf = W.astype(jnp.bfloat16)

    def v_to_h(vis, u):
        pre = jnp.dot(vis.astype(jnp.bfloat16), W_bf.T,
                      preferred_element_type=jnp.float32) + h_bias
        p = 1.0 / (1.0 + jnp.exp(-pre))
        return jnp.where(p > u, 1.0, 0.0)

    def h_to_v(hid, u):
        pre = jnp.dot(hid.astype(jnp.bfloat16), W_bf,
                      preferred_element_type=jnp.float32) + v_bias
        p = 1.0 / (1.0 + jnp.exp(-pre))
        return jnp.where(p > u, 1.0, 0.0)

    k = u_v.shape[0]
    h_ = v_to_h(v.astype(jnp.float32), u_h[0])
    v_ = v.astype(jnp.float32)
    for step in range(k):
        v_ = h_to_v(h_, u_v[step])
        h_ = v_to_h(v_, u_h[step + 1])
    return v_, h_


if __name__ == "__main__":
    # Small (8,128)-friendly shapes consistent with the module; batch is
    # chosen so the grid actually has >1 tile.
    B, n_vis, n_hid, k = 16, 256, 128, 1

    key = jax.random.PRNGKey(0)
    k_v, k_w, k_uh, k_uv = jax.random.split(key, 4)

    # Deterministic "MNIST-like" binary visible input.
    v = (jax.random.uniform(k_v, (B, n_vis), dtype=jnp.float32) > 0.5).astype(jnp.float32)
    # W = randn(n_hid, n_vis) * 0.01 ; biases zero — as in RBM.__init__.
    W = jax.random.normal(k_w, (n_hid, n_vis), dtype=jnp.float32) * 0.01
    v_bias = jnp.zeros((n_vis,), dtype=jnp.float32)
    h_bias = jnp.zeros((n_hid,), dtype=jnp.float32)

    # Uniform randoms for the 2k+1 Bernoulli samples (torch.rand equivalent).
    u_h = jax.random.uniform(k_uh, (k + 1, B, n_hid), dtype=jnp.float32)
    u_v = jax.random.uniform(k_uv, (k, B, n_vis), dtype=jnp.float32)

    v0, v_k, h_k = rbm_forward(v, W, v_bias, h_bias, u_h, u_v, tb=8)
    jax.block_until_ready((v0, v_k, h_k))

    assert v0.shape == (B, n_vis) and v_k.shape == (B, n_vis) and h_k.shape == (B, n_hid)
    # Samples must be binary {0,1}.
    assert bool(jnp.all((v_k == 0.0) | (v_k == 1.0)))
    assert bool(jnp.all((h_k == 0.0) | (h_k == 1.0)))
    # Pass-through of the input visible units.
    assert bool(jnp.all(v0 == v))

    # Cross-check against a pure-JAX reference using the same uniforms; allow
    # a tiny mismatch budget for p ~ u boundary flips from accumulation-order
    # differences between MXU and the reference dot.
    v_ref, h_ref = _rbm_reference(v, W, v_bias, h_bias, u_h, u_v)
    assert float(jnp.mean(jnp.abs(v_k - v_ref))) < 0.005
    assert float(jnp.mean(jnp.abs(h_k - h_ref))) < 0.005

    print("KERNEL_OK")
</pallas_src>

<mosaic_0001>
module attributes {stable_mosaic.version = 11 : i64} {
  func.func @_rbm_kernel(%arg0: i32, %arg1: memref<8x256xf32, #tpu.memory_space<vmem>>, %arg2: memref<128x256xbf16, #tpu.memory_space<vmem>>, %arg3: memref<256x128xbf16, #tpu.memory_space<vmem>>, %arg4: memref<1x256xf32, #tpu.memory_space<vmem>>, %arg5: memref<1x128xf32, #tpu.memory_space<vmem>>, %arg6: memref<2x8x128xf32, #tpu.memory_space<vmem>>, %arg7: memref<1x8x256xf32, #tpu.memory_space<vmem>>, %arg8: memref<8x256xf32, #tpu.memory_space<vmem>>, %arg9: memref<8x128xf32, #tpu.memory_space<vmem>>) attributes {dimension_semantics = [#tpu.dimension_semantics<parallel>], iteration_bounds = array<i64: 2>, scalar_prefetch = 0 : i64, scratch_operands = 0 : i64, tpu.core_type = #tpu.core_type<tc>, window_params = [{transform_indices = @transform_0, window_bounds = array<i64: 8, 256>}, {pipeline_mode = #tpu.pipeline_mode<synchronous>, transform_indices = @transform_1, window_bounds = array<i64: 128, 256>}, {pipeline_mode = #tpu.pipeline_mode<synchronous>, transform_indices = @transform_2, window_bounds = array<i64: 256, 128>}, {pipeline_mode = #tpu.pipeline_mode<synchronous>, transform_indices = @transform_3, window_bounds = array<i64: 1, 256>}, {pipeline_mode = #tpu.pipeline_mode<synchronous>, transform_indices = @transform_4, window_bounds = array<i64: 1, 128>}, {transform_indices = @transform_5, window_bounds = array<i64: 2, 8, 128>}, {transform_indices = @transform_6, window_bounds = array<i64: 1, 8, 256>}, {transform_indices = @transform_7, window_bounds = array<i64: 8, 256>}, {transform_indices = @transform_8, window_bounds = array<i64: 8, 128>}]} {
    %c0 = arith.constant 0 : index
    %c0_0 = arith.constant 0 : index
    %0 = vector.load %arg1[%c0, %c0_0] : memref<8x256xf32, #tpu.memory_space<vmem>>, vector<8x256xf32>
    %c0_1 = arith.constant 0 : index
    %c0_2 = arith.constant 0 : index
    %1 = vector.load %arg2[%c0_1, %c0_2] : memref<128x256xbf16, #tpu.memory_space<vmem>>, vector<128x256xbf16>
    %c0_3 = arith.constant 0 : index
    %c0_4 = arith.constant 0 : index
    %2 = vector.load %arg3[%c0_3, %c0_4] : memref<256x128xbf16, #tpu.memory_space<vmem>>, vector<256x128xbf16>
    %c0_5 = arith.constant 0 : index
    %c0_6 = arith.constant 0 : index
    %3 = vector.load %arg4[%c0_5, %c0_6] : memref<1x256xf32, #tpu.memory_space<vmem>>, vector<1x256xf32>
    %c0_7 = arith.constant 0 : index
    %c0_8 = arith.constant 0 : index
    %4 = vector.load %arg5[%c0_7, %c0_8] : memref<1x128xf32, #tpu.memory_space<vmem>>, vector<1x128xf32>
    %c0_9 = arith.constant 0 : index
    %c0_10 = arith.constant 0 : index
    %c0_11 = arith.constant 0 : index
    %5 = vector.load %arg6[%c0_9, %c0_10, %c0_11] : memref<2x8x128xf32, #tpu.memory_space<vmem>>, vector<1x8x128xf32>
    %6 = vector.shape_cast %5 : vector<1x8x128xf32> to vector<8x128xf32>
    %7 = arith.truncf %0 : vector<8x256xf32> to vector<8x256xbf16>
    %cst = arith.constant dense<0.000000e+00> : vector<8x128xf32>
    %8 = tpu.matmul %7, %2, %cst {dimension_numbers = #tpu.dot_dimension_numbers<[1], [0], [0], [1], [0, 0, 1, 1], [], []>} : vector<8x256xbf16>, vector<256x128xbf16>, vector<8x128xf32> -> vector<8x128xf32>
    %9 = vector.broadcast %4 : vector<1x128xf32> to vector<8x128xf32>
    %10 = arith.addf %8, %9 : vector<8x128xf32>
    %cst_12 = arith.constant 0.000000e+00 : f32
    %11 = vector.broadcast %cst_12 : f32 to vector<8x128xf32>
    %12 = arith.subf %11, %10 : vector<8x128xf32>
    %13 = math.exp %12 : vector<8x128xf32>
    %cst_13 = arith.constant 1.000000e+00 : f32
    %14 = vector.broadcast %cst_13 : f32 to vector<8x128xf32>
    %15 = arith.addf %14, %13 : vector<8x128xf32>
    %cst_14 = arith.constant 1.000000e+00 : f32
    %16 = vector.broadcast %cst_14 : f32 to vector<8x128xf32>
    %17 = arith.divf %16, %15 : vector<8x128xf32>
    %18 = arith.cmpf ogt, %17, %6 : vector<8x128xf32>
    %cst_15 = arith.constant 1.000000e+00 : f32
    %cst_16 = arith.constant 0.000000e+00 : f32
    %19 = vector.broadcast %cst_15 : f32 to vector<8x128xf32>
    %20 = vector.broadcast %cst_16 : f32 to vector<8x128xf32>
    %21 = arith.select %18, %19, %20 : vector<8x128xi1>, vector<8x128xf32>
    %c0_17 = arith.constant 0 : index
    %c0_18 = arith.constant 0 : index
    %c0_19 = arith.constant 0 : index
    %22 = vector.load %arg7[%c0_17, %c0_18, %c0_19] : memref<1x8x256xf32, #tpu.memory_space<vmem>>, vector<1x8x256xf32>
    %23 = vector.shape_cast %22 : vector<1x8x256xf32> to vector<8x256xf32>
    %24 = arith.truncf %21 : vector<8x128xf32> to vector<8x128xbf16>
    %cst_20 = arith.constant dense<0.000000e+00> : vector<8x256xf32>
    %25 = tpu.matmul %24, %1, %cst_20 {dimension_numbers = #tpu.dot_dimension_numbers<[1], [0], [0], [1], [0, 0, 1, 1], [], []>} : vector<8x128xbf16>, vector<128x256xbf16>, vector<8x256xf32> -> vector<8x256xf32>
    %26 = vector.broadcast %3 : vector<1x256xf32> to vector<8x256xf32>
    %27 = arith.addf %25, %26 : vector<8x256xf32>
    %cst_21 = arith.constant 0.000000e+00 : f32
    %28 = vector.broadcast %cst_21 : f32 to vector<8x256xf32>
    %29 = arith.subf %28, %27 : vector<8x256xf32>
    %30 = math.exp %29 : vector<8x256xf32>
    %cst_22 = arith.constant 1.000000e+00 : f32
    %31 = vector.broadcast %cst_22 : f32 to vector<8x256xf32>
    %32 = arith.addf %31, %30 : vector<8x256xf32>
    %cst_23 = arith.constant 1.000000e+00 : f32
    %33 = vector.broadcast %cst_23 : f32 to vector<8x256xf32>
    %34 = arith.divf %33, %32 : vector<8x256xf32>
    %35 = arith.cmpf ogt, %34, %23 : vector<8x256xf32>
    %cst_24 = arith.constant 1.000000e+00 : f32
    %cst_25 = arith.constant 0.000000e+00 : f32
    %36 = vector.broadcast %cst_24 : f32 to vector<8x256xf32>
    %37 = vector.broadcast %cst_25 : f32 to vector<8x256xf32>
    %38 = arith.select %35, %36, %37 : vector<8x256xi1>, vector<8x256xf32>
    %c1 = arith.constant 1 : index
    %c0_26 = arith.constant 0 : index
    %c0_27 = arith.constant 0 : index
    %39 = vector.load %arg6[%c1, %c0_26, %c0_27] : memref<2x8x128xf32, #tpu.memory_space<vmem>>, vector<1x8x128xf32>
    %40 = vector.shape_cast %39 : vector<1x8x128xf32> to vector<8x128xf32>
    %41 = arith.truncf %38 : vector<8x256xf32> to vector<8x256xbf16>
    %cst_28 = arith.constant dense<0.000000e+00> : vector<8x128xf32>
    %42 = tpu.matmul %41, %2, %cst_28 {dimension_numbers = #tpu.dot_dimension_numbers<[1], [0], [0], [1], [0, 0, 1, 1], [], []>} : vector<8x256xbf16>, vector<256x128xbf16>, vector<8x128xf32> -> vector<8x128xf32>
    %43 = vector.broadcast %4 : vector<1x128xf32> to vector<8x128xf32>
    %44 = arith.addf %42, %43 : vector<8x128xf32>
    %cst_29 = arith.constant 0.000000e+00 : f32
    %45 = vector.broadcast %cst_29 : f32 to vector<8x128xf32>
    %46 = arith.subf %45, %44 : vector<8x128xf32>
    %47 = math.exp %46 : vector<8x128xf32>
    %cst_30 = arith.constant 1.000000e+00 : f32
    %48 = vector.broadcast %cst_30 : f32 to vector<8x128xf32>
    %49 = arith.addf %48, %47 : vector<8x128xf32>
    %cst_31 = arith.constant 1.000000e+00 : f32
    %50 = vector.broadcast %cst_31 : f32 to vector<8x128xf32>
    %51 = arith.divf %50, %49 : vector<8x128xf32>
    %52 = arith.cmpf ogt, %51, %40 : vector<8x128xf32>
    %cst_32 = arith.constant 1.000000e+00 : f32
    %cst_33 = arith.constant 0.000000e+00 : f32
    %53 = vector.broadcast %cst_32 : f32 to vector<8x128xf32>
    %54 = vector.broadcast %cst_33 : f32 to vector<8x128xf32>
    %55 = arith.select %52, %53, %54 : vector<8x128xi1>, vector<8x128xf32>
    %c0_34 = arith.constant 0 : index
    %c0_35 = arith.constant 0 : index
    %56 = vector.load %arg8[%c0_34, %c0_35] : memref<8x256xf32, #tpu.memory_space<vmem>>, vector<8x256xf32>
    tpu.vector_store %arg8[%c0_34, %c0_35], %38 {strides = array<i32>} : memref<8x256xf32, #tpu.memory_space<vmem>>, vector<8x256xf32>,
    %c0_36 = arith.constant 0 : index
    %c0_37 = arith.constant 0 : index
    %57 = vector.load %arg9[%c0_36, %c0_37] : memref<8x128xf32, #tpu.memory_space<vmem>>, vector<8x128xf32>
    tpu.vector_store %arg9[%c0_36, %c0_37], %55 {strides = array<i32>} : memref<8x128xf32, #tpu.memory_space<vmem>>, vector<8x128xf32>,
    return
  }
  func.func @transform_0(%arg0: i32) -> (i32, i32) {
    %c0_i32 = arith.constant 0 : i32
    %c0_i32_0 = arith.constant 0 : i32
    return %arg0, %c0_i32 : i32, i32
  }
  func.func @transform_1(%arg0: i32) -> (i32, i32) {
    %c0_i32 = arith.constant 0 : i32
    %c0_i32_0 = arith.constant 0 : i32
    %c0_i32_1 = arith.constant 0 : i32
    return %c0_i32, %c0_i32_0 : i32, i32
  }
  func.func @transform_2(%arg0: i32) -> (i32, i32) {
    %c0_i32 = arith.constant 0 : i32
    %c0_i32_0 = arith.constant 0 : i32
    %c0_i32_1 = arith.constant 0 : i32
    return %c0_i32, %c0_i32_0 : i32, i32
  }
  func.func @transform_3(%arg0: i32) -> (i32, i32) {
    %c0_i32 = arith.constant 0 : i32
    %c0_i32_0 = arith.constant 0 : i32
    %c0_i32_1 = arith.constant 0 : i32
    return %c0_i32, %c0_i32_0 : i32, i32
  }
  func.func @transform_4(%arg0: i32) -> (i32, i32) {
    %c0_i32 = arith.constant 0 : i32
    %c0_i32_0 = arith.constant 0 : i32
    %c0_i32_1 = arith.constant 0 : i32
    return %c0_i32, %c0_i32_0 : i32, i32
  }
  func.func @transform_5(%arg0: i32) -> (i32, i32, i32) {
    %c0_i32 = arith.constant 0 : i32
    %c0_i32_0 = arith.constant 0 : i32
    %c0_i32_1 = arith.constant 0 : i32
    return %c0_i32, %arg0, %c0_i32_0 : i32, i32, i32
  }
  func.func @transform_6(%arg0: i32) -> (i32, i32, i32) {
    %c0_i32 = arith.constant 0 : i32
    %c0_i32_0 = arith.constant 0 : i32
    %c0_i32_1 = arith.constant 0 : i32
    return %c0_i32, %arg0, %c0_i32_0 : i32, i32, i32
  }
  func.func @transform_7(%arg0: i32) -> (i32, i32) {
    %c0_i32 = arith.constant 0 : i32
    %c0_i32_0 = arith.constant 0 : i32
    return %arg0, %c0_i32 : i32, i32
  }
  func.func @transform_8(%arg0: i32) -> (i32, i32) {
    %c0_i32 = arith.constant 0 : i32
    %c0_i32_0 = arith.constant 0 : i32
    return %arg0, %c0_i32 : i32, i32
  }
}

</mosaic_0001>

<bundles_post_ra>
// kernel: tpu_custom_call.1
= control target key start
LH: loop header
LB: loop body
LE: loop exit
PB: predicated region body
PF: predicated region fallthrough
CT: control target
= control target key end

     0   :  { %s1904_s0 = inlined_call_operand.hbm [shape: f32[16,256], index: 0, kind: input, shape index: {}]   ;;  %s1905_s1 = inlined_call_operand.hbm [shape: bf16[128,256], index: 1, kind: input, shape index: {}]   ;;  %s1906_s2 = inlined_call_operand.hbm [shape: bf16[256,128], index: 2, kind: input, shape index: {}]   ;;  %s1907_s3 = inlined_call_operand.vmem [shape: f32[1,256], index: 3, kind: input, shape index: {}]   ;;  %s1908_s4 = inlined_call_operand.vmem [shape: f32[1,128], index: 4, kind: input, shape index: {}]   ;;  %s1909_s5 = inlined_call_operand.hbm [shape: f32[2,16,128], index: 5, kind: input, shape index: {}]   ;;  %s1910_s6 = inlined_call_operand.hbm [shape: f32[1,16,256], index: 6, kind: input, shape index: {}]   ;;  %s1911_s7 = inlined_call_operand.hbm [shape: f32[16,256], index: 7, kind: output, shape index: {0}]   ;;  %s1912_s8 = inlined_call_operand.hbm [shape: f32[16,128], index: 8, kind: output, shape index: {1}]  }
   0x1   :  { %1928 = sst [smem:[#allocation23_spill]] %s1904_s0 }
   0x2   :  { %1929 = sst [smem:[#allocation24_spill]] %s1905_s1 }
   0x3   :  { %1930 = sst [smem:[#allocation25_spill]] %s1909_s5 }
   0x4   :  { %1931 = sst [smem:[#allocation26_spill]] %s1912_s8 }
   0x5   :  { %14 = vsyncpa [#allocation3], 0 }
   0x6   :  { %16 = vsyncpa [#allocation3 + $0x1], 0 }
   0x7   :  { %17 = vsyncpa [#allocation6], 0 }
   0x8   :  { %18 = vsyncpa [#allocation9], 0 }
   0x9   :  { %20 = vsyncpa [#allocation9 + $0x1], 0 }
   0xa   :  { %21 = vsyncpa [#allocation4], 0 }
   0xb   :  { %23 = vsyncpa [#allocation4 + $0x1], 0 }
   0xc   :  { %24 = vsyncpa [#allocation13], 0 }
   0xd   :  { %26 = vsyncpa [#allocation13 + $0x1], 0  ;;  %s1606_s27 = smov 0   ;;  %s1608_s28 = smov 0  }
   0xe   :  { %s1610_s29 = smov 0   ;;  %s1612_s30 = smov 0  }
   0xf LB: > { %1932 = sst [smem:[#allocation19_spill]] %s1532_s27  ;;  %s1627_s9 = sadd.s32 4294967295, %s1544_s30   ;;  %s1544_s30 = sphi %s1612_s30, %s1962_s30   ;;  %s1540_s29 = sphi %s1610_s29, %s1966_s29   ;;  %s1536_s28 = sphi %s1608_s28, %s1965_s28   ;;  %s1532_s27 = sphi %s1606_s27, %s1964_s27  }
  0x10   : > { %s1045_s10 = sadd.s32 4294967294, %s1544_s30   ;;  %s1631_s11 = sadd.s32 1, %s1544_s30  }
  0x11   : > { %1933 = sst [smem:[#allocation20_spill]] %s1631_s11  ;;  %s39_s12 = sadd.s32 1, %s1540_s29 }
  0x12   : > { %s36_s13 = ssub.s32 %s1544_s30, %s1631_s11  ;;  %p46_p0 = scmp.ne.s32.totalorder %s1540_s29, %s1536_s28 }
  0x13   : > { %p37_p1 = scmp.eq.s32.totalorder %s36_s13, 0  ;;  %p47_p2 = scmp.eq.s32.totalorder %s1544_s30, 0 }
  0x14   : > { %p52_p3 = scmp.ne.s32.totalorder %s1536_s28, %s1532_s27  ;;  %p1913_p4 = scmp.eq.s32.totalorder %s1627_s9, 0 }
  0x15   : > { %s1643_s14 = scalar_select %p37_p1, %s1540_s29, %s39_s12  }
  0x16   : > { %p1645_p5 = por %p47_p2, %p46_p0  ;;  %p1651_p6 = por %p1913_p4, %p52_p3 }
  0x17   : > { %1934 = sst [smem:[#allocation21_spill]] %s1643_s14  ;;  %p212_p7 = scmp.eq.s32.totalorder %s1627_s9, 1 }
  0x18   : > { %s1936_s16 = scalar_select %p1651_p6, 1, 0 }
  0x19   : > { %p218_p8 = scmp.eq.s32.totalorder %s1045_s10, 1  ;;  %p1046_p9 = scmp.ge.s32.totalorder %s1544_s30, 1 }
  0x1a   : > { %p251_p10 = scmp.lt.s32.totalorder %s1544_s30, 3  ;;  %p1658_p11 = por %p212_p7, %p46_p0 }
  0x1b   : > { %p1662_p12 = por %p218_p8, %p52_p3  ;;  %s1546_s20 = smov [#allocation5]  }
  0x1c   : > { %s1937_s17 = scalar_select %p1658_p11, 1, 0 }
  0x1d   : > { %s1938_s18 = scalar_select %p1662_p12, 1, 0 }
  0x1e   : > { %p1666_p13 = pnand %p1046_p9, %p251_p10  ;;  %s263_s21 = sshll.u32 %s1546_s20, 4  ;;  %s264_s21 = int_to_ptr.vmem [resolvable:$true] %s263_s21 }
  0x1f   : > { %1939 = sst [smem:[#allocation22_spill]] %s1938_s18  ;;  %p1204_p3 = scmp.lt.s32.totalorder %s1544_s30, 2 }
  0x20   : > { %s1940_s19 = scalar_select %p1666_p13, 1, 0 }
  0x21   : > { %p1178_p1 = pneg %p1666_p13  ;;  %s1915_s23 = sand.u32 1, %s1540_s29  }
  0x22   : > { %s1683_s24 = sshll.u32 %s1915_s23, 4  ;;  %s1317_s25 = scalar_lea.vmem %s264_s21, 2048 }
  0x23   : > { %p1674_p2 = pnand %p1178_p1, %p1913_p4  ;;  %p1318_p8 = scmp.ne.s32.totalorder %s264_s21, %s1317_s25 }
  0x24   : > { %p1325_p1 = scmp.lt.s32.totalorder %s264_s21, %s264_s21  ;;  %p1326_p4 = scmp.lt.s32.totalorder %s1317_s25, %s1317_s25 }
  0x25   : > { %s1941_s22 = scalar_select %p1674_p2, 1, 0 }
  0x26   : > { %p1922_p7 = pneg %p1674_p2  ;;  %p1327_p12 = por %p1326_p4, %p1325_p1 }
  0x28   : > { %p1320_p9 = pnand %p1318_p8, %p1922_p7 }
  0x2a   : > { %p1321_p10 = pneg %p1320_p9 }
  0x2c   : > { %p1328_p11 = pnand %p1327_p12, %p1321_p10 }
  0x2e   : > { %1331 = shalt.err (!%p1328_p11)
}
  0x2f   : > { %s1920_s26 = smov 128   ;;  %s1921_s10 = smov 8  }
  0x30   : > { %s1942_s1 = sld [smem:[#allocation24_spill]]  ;;  %p1702_p4 = pnand %p1204_p3, %p1645_p5 }
  0x31   : > { %s315_s25 = sand.u32 1, %s1544_s30   ;;  %s1054_s23 = sshll.u32 %s1544_s30, 7 }
  0x32   : > { %s1944_s5 = sld [smem:[#allocation25_spill]]  ;;  %s319_s27 = scalar_lea.vmem [#allocation8], %s1683_s24 }
  0x33   : > { %s325_s12 = sshll.u32 %s319_s27, 4  ;;  %s1716_s15 = scalar_lea.sflag [#allocation9], %s315_s25  ;;  %s1714_s12 = int_to_ptr.vmem [resolvable:$true] %s325_s12 }
  0x34   : > { %p1722_p11 = pneg %p1702_p4 }
  0x36   : > { %1181 = dma.hbm_to_vmem [thread:$0]  (!%p1674_p2), %s1942_s1, 2048, %s264_s21, [#allocation6], %s1920_s26, %s1920_s26, %s1921_s10  }
  0x38   : > { %s1711_s18 = scalar_lea.hbm %s1944_s5, %s1054_s23  ;;  %s1337_s23 = scalar_lea.hbm %s1944_s5, 512 }
  0x39   : > { %s1332_s21 = scalar_lea.hbm %s1711_s18, 256  ;;  %p1338_p8 = scmp.lt.s32.totalorder %s1711_s18, %s1944_s5 }
  0x3a   : > { %p1333_p5 = scmp.ne.s32.totalorder %s1711_s18, %s1332_s21  ;;  %p1339_p9 = scmp.lt.s32.totalorder %s1337_s23, %s1332_s21 }
  0x3c   : > { %p1335_p12 = pnand %p1722_p11, %p1333_p5  ;;  %p1340_p10 = por %p1339_p9, %p1338_p8 }
  0x3e   : > { %p1336_p3 = pneg %p1335_p12 }
  0x40   : > { %p1341_p1 = pnand %p1340_p10, %p1336_p3 }
  0x42   : > { %1344 = shalt.err (!%p1341_p1)
}
  0x43   : > { %s1345_s25 = scalar_lea.vmem %s1714_s12, 256  ;;  %s1549_s10 = smov [#allocation8]  }
  0x44   : > { %p1346_p0 = scmp.ne.s32.totalorder %s1714_s12, %s1345_s25  ;;  %s1350_s11 = sshll.u32 %s1549_s10, 4  ;;  %s1351_s11 = int_to_ptr.vmem [resolvable:$false] %s1350_s11 }
  0x45   : > { %s1352_s14 = scalar_lea.vmem %s1351_s11, 512  ;;  %p1353_p7 = scmp.lt.s32.totalorder %s1714_s12, %s1351_s11 }
  0x46   : > { %p1348_p5 = pnand %p1346_p0, %p1722_p11  ;;  %p1354_p6 = scmp.lt.s32.totalorder %s1352_s14, %s1345_s25 }
  0x48   : > { %p1349_p12 = pneg %p1348_p5  ;;  %p1355_p13 = por %p1354_p6, %p1353_p7 }
  0x4a   : > { %p1356_p2 = pnand %p1355_p13, %p1349_p12 }
  0x4c   : > { %1359 = shalt.err (!%p1356_p2)
}
  0x4d   : > { %s1550_s26 = smov 256   ;;  %s1946_s21 = smov 8  }
  0x4e   : > { %s1947_s23 = smov 128   ;;  %s1551_s27 = smov [#allocation7]  }
  0x4f   : > { %1191 = dma.hbm_to_vmem [thread:$0]  (!%p1702_p4), %s1711_s18, 256, %s1714_s12, %s1716_s15, %s1550_s26, %s1947_s23, %s1946_s21  }
  0x50   : > { %s276_s1 = sshll.u32 %s1551_s27, 4  ;;  %p1948_p3 = scmp.ne.s32.totalorder %s1941_s22, 0  ;;  %s277_s1 = int_to_ptr.vmem [resolvable:$true] %s276_s1 }
  0x51   : > { %s1371_s10 = scalar_lea.vmem %s277_s1, 2048  ;;  %p1379_p2 = scmp.lt.s32.totalorder %s277_s1, %s277_s1 }
  0x52   : > { %p1372_p0 = scmp.ne.s32.totalorder %s277_s1, %s1371_s10  ;;  %p1949_p8 = pneg %p1948_p3 }
  0x53   : > { %p1380_p7 = scmp.lt.s32.totalorder %s1371_s10, %s1371_s10 }
  0x54   : > { %p1374_p6 = pnand %p1372_p0, %p1949_p8 }
  0x55   : > { %p1381_p9 = por %p1380_p7, %p1379_p2 }
  0x56   : > { %p1375_p13 = pneg %p1374_p6 }
  0x58   : > { %p1382_p10 = pnand %p1381_p9, %p1375_p13 }
  0x5a   : > { %1385 = shalt.err (!%p1382_p10)
}
  0x5b   : > { %s1552_s25 = smov 64   ;;  %s1553_s18 = smov 4  }
  0x5c   : > { %1184 = dma.hbm_to_vmem [thread:$0]  (!%p1948_p3), %s1906_s2, 2048, %s277_s1, [#allocation6], %s1552_s25, %s1552_s25, %s1553_s18  }
  0x5d   : > { %s1113_s14 = sshll.u32 %s1544_s30, 8  ;;  %s1950_s0 = sld [smem:[#allocation23_spill]] }
  0x5e   : > { %s300_s27 = scalar_lea.vmem [#allocation2], %s1683_s24  ;;  %s1951_s5 = sand.u32 1, %s1540_s29  }
  0x5f   : > { %s308_s10 = sshll.u32 %s300_s27, 4  ;;  %s297_s8 = scalar_lea.sflag [#allocation3], %s1951_s5  ;;  %s309_s10 = int_to_ptr.vmem [resolvable:$true] %s308_s10 }
  0x63   : > { %s1761_s23 = scalar_lea.hbm %s1950_s0, %s1113_s14  ;;  %s1391_s18 = scalar_lea.hbm %s1950_s0, 512 }
  0x64   : > { %s1386_s22 = scalar_lea.hbm %s1761_s23, 256  ;;  %p1392_p0 = scmp.lt.s32.totalorder %s1761_s23, %s1950_s0 }
  0x65   : > { %p1387_p1 = scmp.ne.s32.totalorder %s1761_s23, %s1386_s22  ;;  %p1393_p3 = scmp.lt.s32.totalorder %s1391_s18, %s1386_s22 }
  0x67   : > { %p1389_p5 = pnand %p1387_p1, %p1722_p11  ;;  %p1394_p8 = por %p1393_p3, %p1392_p0 }
  0x69   : > { %p1390_p12 = pneg %p1389_p5 }
  0x6b   : > { %p1395_p6 = pnand %p1394_p8, %p1390_p12 }
  0x6d   : > { %1398 = shalt.err (!%p1395_p6)
}
  0x6e   : > { %s1399_s26 = scalar_lea.vmem %s309_s10, 256  ;;  %s1554_s5 = smov [#allocation2]  }
  0x6f   : > { %p1400_p13 = scmp.ne.s32.totalorder %s309_s10, %s1399_s26  ;;  %s1404_s21 = sshll.u32 %s1554_s5, 4  ;;  %s1405_s21 = int_to_ptr.vmem [resolvable:$false] %s1404_s21 }
  0x70   : > { %s1406_s27 = scalar_lea.vmem %s1405_s21, 512  ;;  %p1407_p9 = scmp.lt.s32.totalorder %s309_s10, %s1405_s21 }
  0x71   : > { %p1402_p2 = pnand %p1400_p13, %p1722_p11  ;;  %p1408_p10 = scmp.lt.s32.totalorder %s1406_s27, %s1399_s26 }
  0x73   : > { %p1403_p7 = pneg %p1402_p2  ;;  %p1409_p1 = por %p1408_p10, %p1407_p9 }
  0x75   : > { %p1410_p5 = pnand %p1409_p1, %p1403_p7 }
  0x77   : > { %1413 = shalt.err (!%p1410_p5)
}
  0x78   : > { %1188 = dma.hbm_to_vmem [thread:$0]  (!%p1702_p4), %s1761_s23, 256, %s309_s10, %s297_s8  }
  0x79   : > { %s345_s25 = scalar_lea.hbm %s1910_s6, %s1113_s14  ;;  %s339_s18 = scalar_lea.vmem [#allocation10], %s1683_s24 }
  0x7a   : > { %s347_s12 = sshll.u32 %s339_s18, 4  ;;  %s1414_s11 = scalar_lea.hbm %s345_s25, 256  ;;  %s348_s12 = int_to_ptr.vmem [resolvable:$true] %s347_s12 }
  0x7b   : > { %p1415_p12 = scmp.ne.s32.totalorder %s345_s25, %s1414_s11  ;;  %s1419_s21 = scalar_lea.hbm %s1910_s6, 512 }
  0x7c   : > { %p1420_p8 = scmp.lt.s32.totalorder %s345_s25, %s1910_s6  ;;  %p1421_p6 = scmp.lt.s32.totalorder %s1419_s21, %s1414_s11 }
  0x7d   : > { %p1417_p0 = pnand %p1415_p12, %p1722_p11 }
  0x7e   : > { %p1422_p13 = por %p1421_p6, %p1420_p8 }
  0x7f   : > { %p1418_p3 = pneg %p1417_p0 }
  0x81   : > { %p1423_p2 = pnand %p1422_p13, %p1418_p3 }
  0x83   : > { %1426 = shalt.err (!%p1423_p2)
}
  0x84   : > { %s1427_s8 = scalar_lea.vmem %s348_s12, 256  ;;  %s1555_s24 = smov [#allocation10]  }
  0x85   : > { %p1428_p7 = scmp.ne.s32.totalorder %s348_s12, %s1427_s8  ;;  %s1432_s14 = sshll.u32 %s1555_s24, 4  ;;  %s1433_s14 = int_to_ptr.vmem [resolvable:$false] %s1432_s14 }
  0x86   : > { %s1434_s23 = scalar_lea.vmem %s1433_s14, 512  ;;  %p1435_p1 = scmp.lt.s32.totalorder %s348_s12, %s1433_s14 }
  0x87   : > { %p1430_p9 = pnand %p1428_p7, %p1722_p11  ;;  %p1436_p5 = scmp.lt.s32.totalorder %s1434_s23, %s1427_s8 }
  0x89   : > { %p1431_p10 = pneg %p1430_p9  ;;  %p1437_p12 = por %p1436_p5, %p1435_p1 }
  0x8b   : > { %p1438_p0 = pnand %p1437_p12, %p1431_p10 }
  0x8d   : > { %1441 = shalt.err (!%p1438_p0)
}
  0x8e   : > { %1194 = dma.hbm_to_vmem [thread:$0]  (!%p1702_p4), %s345_s25, 256, %s348_s12, %s1716_s15  }
  0x8f   : > { %p1952_p3 = scmp.ne.s32.totalorder %s1940_s19, 0 }
  0x90   : > { %s1804_s0 = sand.u32 (!%p1952_p3), 1, %s1536_s28   ;;  %p1953_p11 = scmp.ne.s32.totalorder (!%p1952_p3), %s1936_s16, 0 }
  0x91   : > { %356 = sbr.rel (%p1952_p3) target bundleno = 907 (0x38b), region = 48  ;;  %s1807_s13 = sshll.u32 (!%p1952_p3), %s1804_s0, 4 }
  0x92   : > { %s359_s10 = scalar_lea.sflag (!%p1952_p3), [#allocation3], %s1804_s0  ;;  %s362_s22 = scalar_lea.vmem (!%p1952_p3), [#allocation2], %s1807_s13 }
  0x96   : > { %1511 = dma.done.wait (%p1953_p11), %s359_s10, 256  }
  0x97   : > { %1513 = vsyncadd (%p1953_p11), %s359_s10, 4294967040  ;;  %p1954_p4 = scmp.eq.s32.totalorder %s1627_s9, 0 }
  0x99   : > { %1515 = dma.done.wait (%p1954_p4), [#allocation6], 4096   ;;  %p1955_p8 = pmov %p1954_p4 }
  0x9a   : > { %s375_s19 = sand.u32 1, %s1627_s9   ;;  %s379_s15 = scalar_lea.vmem [#allocation8], %s1807_s13 }
  0x9b   : > { %1517 = vsyncadd (%p1955_p8), [#allocation6], 4294963200  ;;  %s376_s20 = scalar_lea.sflag [#allocation9], %s375_s19 }
  0x9c   : > { %1519 = dma.done.wait (%p1953_p11), %s376_s20, 512  }
  0x9d   : > { %1521 = vsyncadd (%p1953_p11), %s376_s20, 4294966784  ;;  %v1250_v0 = vld [vmem:[#allocation7 + $0x78] sm:$0xff]   ;;  %v1252_v2 = vld [vmem:[#allocation7 + $0x70] sm:$0xff]   ;;  %v1556_v33 = vmov 0   ;;  %v1557_v50 = vmov 1.0|1.0   ;;  %v646_v51 = vlaneseq }
  0x9e   : > { %v1251_v1 = vld [vmem:[#allocation7 + $0x38] sm:$0xff]   ;;  %1116 = vmatprep.subr.bf16.mxu0 %v1250_v0  ;;  %v1253_v3 = vld [vmem:[#allocation7 + $0x30] sm:$0xff]   ;;  %v1254_v4 = vld [vmem:[#allocation7 + $0x68] sm:$0xff]   ;;  %768 = vmatprep.mubr.bf16.mxu1 %v1556_v33  ;;  %s388_s12 = scalar_lea.vmem [#allocation10], %s1807_s13  ;;  %s428_s11 = scalar_lea.vmem [#allocation11], %s1807_s13 }
  0x9f   : > { %1117 = vmatpush3.bf16.msra.mxu0 %v1251_v1  ;;  %v1255_v5 = vld [vmem:[#allocation7 + $0x28] sm:$0xff]   ;;  %v1256_v6 = vld [vmem:[#allocation7 + $0x60] sm:$0xff]   ;;  %v1258_v8 = vld [vmem:[#allocation7 + $0x58] sm:$0xff]   ;;  %v647_v52 = vshrl.u32 %v646_v51, 7  ;;  %s1115_s26 = sshll.u32 %s1627_s9, 8  ;;  %s868_s8 = sshll.u32 %s428_s11, 4  ;;  %s869_s8 = int_to_ptr.vmem [resolvable:$true] %s868_s8 }
  0xa0   : > { %1118 = vmatprep.subr.bf16.mxu0 %v1252_v2  ;;  %v1257_v7 = vld [vmem:[#allocation7 + $0x20] sm:$0xff]   ;;  %v1259_v9 = vld [vmem:[#allocation7 + $0x18] sm:$0xff]   ;;  %v1260_v10 = vld [vmem:[#allocation7 + $0x50] sm:$0xff]   ;;  %s866_s27 = scalar_lea.hbm %s1911_s7, %s1115_s26  ;;  %s849_s24 = scalar_lea.sflag [#allocation4], %s1804_s0 }
  0xa1   : > { %v438_v11 = vld [vmem:[%s362_s22 + $0x8] sm:$0xff]  ;;  %v1261_v12 = vld [vmem:[#allocation7 + $0x10] sm:$0xff]   ;;  %v1264_v16 = vld [vmem:[#allocation7 + $0x40] sm:$0xff]   ;;  %v648_v53 = vsub.s32 0, %v647_v52  ;;  %v652_v55 = vsub.s32 1, %v647_v52  ;;  %s1442_s14 = scalar_lea.vmem %s869_s8, 256 }
  0xa2   : > { %v491_v13 = vpack.c.bf16 %v438_v11, %v438_v11  ;;  %v1262_v14 = vld [vmem:[#allocation7 + $0x48] sm:$0xff]   ;;  %v1265_v17 = vld [vmem:[#allocation7] sm:$0xff]   ;;  %v1266_v20 = vld [vmem:[#allocation5 + $0x74] ss:$8 sps:$4 sm:$0xff]   ;;  %p1443_p6 = scmp.ne.s32.totalorder %s869_s8, %s1442_s14  ;;  %p1956_p13 = scmp.ne.s32.totalorder %s1937_s17, 0 }
  0xa3   : > { %1119 = vmatpush3.bf16.msra.mxu0 %v1253_v3  ;;  %v1263_v15 = vld [vmem:[#allocation7 + $0x8] sm:$0xff]   ;;  %v437_v18 = vld [vmem:[%s362_s22] sm:$0xff]  ;;  %736 = vmatprep.subr.bf16.mxu1 %v1266_v20  ;;  %s1559_s23 = smov [#allocation11]  }
  0xa4   : > { %1120 = vmatprep.subr.bf16.mxu0 %v1254_v4  ;;  %626 = vmatprep.mubr.bf16.mxu0 %v491_v13  ;;  %v490_v19 = vpack.c.bf16 %v437_v18, %v437_v18  ;;  %v1268_v21 = vld [vmem:[#allocation5 + $0x70] ss:$8 sps:$4 sm:$0xff]   ;;  %v1269_v22 = vld [vmem:[#allocation5 + $0x64] ss:$8 sps:$4 sm:$0xff]   ;;  %v1271_v23 = vld [vmem:[#allocation5 + $0x60] ss:$8 sps:$4 sm:$0xff]   ;;  %p1444_p2 = pnand %p1443_p6, %p1956_p13 }
  0xa5   : > { %737 = vmatpush1.bf16.msra.mxu1 %v1268_v21  ;;  %v1272_v24 = vld [vmem:[#allocation5 + $0x54] ss:$8 sps:$4 sm:$0xff]   ;;  %v1274_v25 = vld [vmem:[#allocation5 + $0x50] ss:$8 sps:$4 sm:$0xff]   ;;  %v1275_v26 = vld [vmem:[#allocation5 + $0x44] ss:$8 sps:$4 sm:$0xff]  }
  0xa6   : > { %738 = vmatprep.subr.bf16.mxu1 %v1269_v22  ;;  %v1277_v27 = vld [vmem:[#allocation5 + $0x40] ss:$8 sps:$4 sm:$0xff]   ;;  %v1278_v28 = vld [vmem:[#allocation5 + $0x34] ss:$8 sps:$4 sm:$0xff]   ;;  %v1280_v29 = vld [vmem:[#allocation5 + $0x30] ss:$8 sps:$4 sm:$0xff]   ;;  %p1445_p7 = pneg %p1444_p2 }
  0xa7   : > { %1121 = vmatpush3.bf16.msra.mxu0 %v1255_v5  ;;  %v1281_v30 = vld [vmem:[#allocation5 + $0x24] ss:$8 sps:$4 sm:$0xff]   ;;  %v1283_v31 = vld [vmem:[#allocation5 + $0x20] ss:$8 sps:$4 sm:$0xff]   ;;  %v1284_v32 = vld [vmem:[#allocation5 + $0x14] ss:$8 sps:$4 sm:$0xff]  }
  0xa8   : > { %1122 = vmatprep.subr.bf16.mxu0 %v1256_v6  ;;  %v1286_v34 = vld [vmem:[#allocation5 + $0x10] ss:$8 sps:$4 sm:$0xff]   ;;  %v1287_v35 = vld [vmem:[#allocation5 + $0x4] ss:$8 sps:$4 sm:$0xff]   ;;  %v1289_v36 = vld [vmem:[#allocation5] ss:$8 sps:$4 sm:$0xff]  }
  0xa9   : > { %739 = vmatpush1.bf16.msra.mxu1 %v1271_v23  ;;  %v1832_v38 = vld [vmem:[%s1908_s4] ss:$0 sm:$0xff]  ;;  %s1446_s10 = sshll.u32 %s1559_s23, 4  ;;  %s1447_s10 = int_to_ptr.vmem [resolvable:$false] %s1446_s10 }
  0xaa   : > { %740 = vmatprep.subr.bf16.mxu1 %v1272_v24  ;;  %v489_v48 = vld [vmem:[%s379_s15] sm:$0xff]  ;;  %s1448_s22 = scalar_lea.vmem %s1447_s10, 512  ;;  %p1449_p9 = scmp.lt.s32.totalorder %s869_s8, %s1447_s10 }
  0xab   : > { %1123 = vmatpush3.bf16.msra.mxu0 %v1257_v7  ;;  %v487_v54 = vld [vmem:[%s1907_s3] sm:$0x3]  ;;  %p1450_p10 = scmp.lt.s32.totalorder %s1448_s22, %s1442_s14 }
  0xac   : > { %1124 = vmatprep.subr.bf16.mxu0 %v1258_v8  ;;  %v649_v56 = vrot.slane %v487_v54, %v648_v53  ;;  %v653_v57 = vrot.slane %v487_v54, %v652_v55 }
  0xad   : > { %741 = vmatpush1.bf16.msra.mxu1 %v1274_v25  ;;  %p1451_p1 = por %p1450_p10, %p1449_p9 }
  0xae   : > { %742 = vmatprep.subr.bf16.mxu1 %v1275_v26 }
  0xaf   : > { %1125 = vmatpush3.bf16.msra.mxu0 %v1259_v9  ;;  %p1452_p5 = pnand %p1451_p1, %p1445_p7 }
  0xb0   : > { %1126 = vmatprep.subr.bf16.mxu0 %v1260_v10 }
  0xb1   : > { %743 = vmatpush1.bf16.msra.mxu1 %v1277_v27 }
  0xb2   : > { %744 = vmatprep.subr.bf16.mxu1 %v1278_v28 }
  0xb3   : > { %1127 = vmatpush3.bf16.msra.mxu0 %v1261_v12 }
  0xb4   : > { %1128 = vmatprep.subr.bf16.mxu0 %v1262_v14 }
  0xb5   : > { %745 = vmatpush1.bf16.msra.mxu1 %v1280_v29 }
  0xb6   : > { %746 = vmatprep.subr.bf16.mxu1 %v1281_v30 }
  0xb7   : > { %1129 = vmatpush3.bf16.msra.mxu0 %v1263_v15 }
  0xb8   : > { %1130 = vmatprep.subr.bf16.mxu0 %v1264_v16 }
  0xb9   : > { %747 = vmatpush1.bf16.msra.mxu1 %v1283_v31 }
  0xba   : > { %748 = vmatprep.subr.bf16.mxu1 %v1284_v32 }
  0xbb   : > { %1131 = vmatpush3.bf16.msra.mxu0 %v1265_v17 }
  0xbc   : > { %1138 = vmatprep.subr.bf16.mxu0 %v1250_v0 }
  0xbd   : > { %749 = vmatpush1.bf16.msra.mxu1 %v1286_v34 }
  0xbe   : > { %627 = vmatmul.mubr.bf16.vlgmr.msra.gmra.mxu0 %v490_v19  ;;  %750 = vmatprep.subr.bf16.mxu1 %v1287_v35 }
  0xbf   : > { %1139 = vmatpush3.bf16.msra.mxu0 %v1251_v1 }
  0xc0   : > { %1140 = vmatprep.subr.bf16.mxu0 %v1252_v2 }
  0xc1   : > { %751 = vmatpush1.bf16.msra.mxu1 %v1289_v36 }
  0xc3   : > { %1141 = vmatpush3.bf16.msra.mxu0 %v1253_v3 }
  0xc4   : > { %1142 = vmatprep.subr.bf16.mxu0 %v1254_v4 }
  0xc7   : > { %1143 = vmatpush3.bf16.msra.mxu0 %v1255_v5 }
  0xc8   : > { %1144 = vmatprep.subr.bf16.mxu0 %v1256_v6 }
  0xcb   : > { %1145 = vmatpush3.bf16.msra.mxu0 %v1257_v7 }
  0xcc   : > { %1146 = vmatprep.subr.bf16.mxu0 %v1258_v8  ;;  %v642_v8 = vld [vmem:[%s388_s12] sm:$0xff] }
  0xcf   : > { %1147 = vmatpush3.bf16.msra.mxu0 %v1259_v9 }
  0xd0   : > { %1148 = vmatprep.subr.bf16.mxu0 %v1260_v10  ;;  %v643_v10 = vld [vmem:[%s388_s12 + $0x8] sm:$0xff] }
  0xd3   : > { %1149 = vmatpush3.bf16.msra.mxu0 %v1261_v12  ;;  %v1558_v12 = vmov 0.0  }
  0xd4   : > { %1150 = vmatprep.subr.bf16.mxu0 %v1262_v14 }
  0xd7   : > { %1151 = vmatpush3.bf16.msra.mxu0 %v1263_v15 }
  0xd8   : > { %1152 = vmatprep.subr.bf16.mxu0 %v1264_v16 }
  0xdb   : > { %1153 = vmatpush3.bf16.msra.mxu0 %v1265_v17 }
 0x17e   : > { %v1132_v37 = vpop.f32.mrf.mxu0 }
 0x180   : > { %v1133_v39 = vpop.f32.mrf.mxu0 }
 0x181   : > { %v1134_v40 = vadd.f32 %v1133_v39, %v1132_v37 }
 0x182   : > { %v1135_v41 = vpop.f32.mrf.mxu0 }
 0x183   : > { %v629_v42 = vadd.f32 %v1134_v40, %v1832_v38 }
 0x184   : > { %v1136_v43 = vpop.f32.mrf.mxu0 }
 0x185   : > { %v634_v44 = vsub.f32 0.0, %v629_v42 }
 0x187   : > { %v635_v45 = vmul.f32 1.442695, %v634_v44 }
 0x189   : > { %1290 = vpow2.f32 %v635_v45 }
 0x196   : > { %v1291_v46 = vpop.eup %1290 }
 0x197   : > { %v637_v47 = vadd.f32 1.0, %v1291_v46 }
 0x199   : > { %1292 = vrcp.f32 %v637_v47 }
 0x1a6   : > { %v1293_v49 = vpop.eup %1292 }
 0x1a7   : > { %vm640_vm0 = vcmp.gt.f32.partialorder %v1293_v49, %v489_v48 }
 0x1a8   : > { %vm1099_vm1 = vmpackc.low %vm640_vm0, %vm640_vm0 }
 0x1a9   : > { %1100 = vmatmul.mubr.msk.bf16.vlgmr.msra.gmra.mxu1 %vm1099_vm1, %v1557_v50 }
 0x269   : > { %v770_v58 = vpop.f32.mrf.mxu1 }
 0x26a   : > { %v771_v59 = vadd.f32 %v770_v58, %v649_v56 }
 0x26b   : > { %v772_v60 = vpop.f32.mrf.mxu1 }
 0x26c   : > { %v777_v61 = vsub.f32 0.0, %v771_v59  ;;  %v773_v62 = vadd.f32 %v772_v60, %v653_v57 }
 0x26d   : > { %v774_v63 = vpop.f32.mrf.mxu1 }
 0x26e   : > { %v779_v0 = vmul.f32 1.442695, %v777_v61  ;;  %v778_v1 = vsub.f32 0.0, %v773_v62 }
 0x26f   : > { %v775_v2 = vpop.f32.mrf.mxu1 }
 0x270   : > { %1294 = vpow2.f32 %v779_v0  ;;  %v781_v3 = vmul.f32 1.442695, %v778_v1 }
 0x272   : > { %1296 = vpow2.f32 %v781_v3 }
 0x27d   : > { %v1295_v4 = vpop.eup %1294 }
 0x27e   : > { %v783_v5 = vadd.f32 1.0, %v1295_v4 }
 0x27f   : > { %v1297_v6 = vpop.eup %1296 }
 0x280   : > { %1298 = vrcp.f32 %v783_v5  ;;  %v784_v7 = vadd.f32 1.0, %v1297_v6 }
 0x282   : > { %1300 = vrcp.f32 %v784_v7 }
 0x28d   : > { %v1299_v9 = vpop.eup %1298 }
 0x28e   : > { %vm789_vm2 = vcmp.gt.f32.partialorder %v1299_v9, %v642_v8 }
 0x28f   : > { %v1301_v11 = vpop.eup %1300  ;;  %v791_v13 = vsel %vm789_vm2, 1.0, %v1558_v12  ;;  %vm1104_vm5 = vmpackc.low %vm789_vm2, %vm789_vm2 }
 0x290   : > { %vm790_vm3 = vcmp.gt.f32.partialorder %v1301_v11, %v643_v10  ;;  %845 = vst [vmem:[%s428_s11] sm:$0xff] %v791_v13 }
 0x291   : > { %v792_v14 = vsel %vm790_vm3, 1.0, %v1558_v12  ;;  %vm1102_vm4 = vmpackc.low %vm790_vm3, %vm790_vm3 }
 0x292   : > { %1103 = vmatprep.mubr.msk.bf16.mxu0 %vm1102_vm4, %v1557_v50  ;;  %846 = vst [vmem:[%s428_s11 + $0x8] sm:$0xff] %v792_v14 }
 0x293   : > { %1105 = vmatmul.mubr.msk.bf16.vlgmr.msra.gmra.mxu0 %vm1104_vm5, %v1557_v50 }
 0x294   : > { %1455 = shalt.err (!%p1452_p5)
}
 0x295   : > { %s1456_s19 = scalar_lea.hbm %s866_s27, 256  ;;  %s1460_s1 = scalar_lea.hbm %s1911_s7, 512 }
 0x296   : > { %p1457_p12 = scmp.ne.s32.totalorder %s866_s27, %s1456_s19  ;;  %p1461_p11 = scmp.lt.s32.totalorder %s866_s27, %s1911_s7 }
 0x297   : > { %p1462_p4 = scmp.lt.s32.totalorder %s1460_s1, %s1456_s19 }
 0x298   : > { %p1458_p0 = pnand %p1457_p12, %p1956_p13 }
 0x299   : > { %p1463_p8 = por %p1462_p4, %p1461_p11 }
 0x29a   : > { %p1459_p3 = pneg %p1458_p0 }
 0x29c   : > { %p1464_p6 = pnand %p1463_p8, %p1459_p3 }
 0x29e   : > { %1467 = shalt.err (!%p1464_p6)
}
 0x29f   : > { %1174 = dma.vmem_to_hbm [thread:$0]  (%p1956_p13), %s869_s8, 256, %s866_s27, %s849_s24   ;;  %v1101_v25 = vld [vmem:[%s379_s15 + $0x8] sm:$0xff] }
 0x2a0   : > { %s1065_s12 = sshll.u32 %s1804_s0, 3  ;;  %s1110_s11 = sshll.u32 %s1627_s9, 7 }
 0x2a1   : > { %s435_s26 = scalar_lea.vmem [#allocation12], %s1065_s12  ;;  %s1957_s8 = sld [smem:[#allocation26_spill]] }
 0x2a2   : > { %s881_s5 = sshll.u32 %s435_s26, 4  ;;  %s854_s14 = scalar_lea.sflag [#allocation13], %s1804_s0  ;;  %s882_s5 = int_to_ptr.vmem [resolvable:$true] %s881_s5 }
 0x2a3   : > { %s1468_s23 = scalar_lea.vmem %s882_s5, 128  ;;  %s1560_s13 = smov [#allocation12]  }
 0x2a4   : > { %p1469_p2 = scmp.ne.s32.totalorder %s882_s5, %s1468_s23  ;;  %s1472_s9 = sshll.u32 %s1560_s13, 4  ;;  %s1473_s9 = int_to_ptr.vmem [resolvable:$false] %s1472_s9 }
 0x2a5   : > { %s1474_s15 = scalar_lea.vmem %s1473_s9, 256  ;;  %p1475_p10 = scmp.lt.s32.totalorder %s882_s5, %s1473_s9 }
 0x2a6   : > { %p1470_p7 = pnand %p1469_p2, %p1956_p13  ;;  %p1476_p1 = scmp.lt.s32.totalorder %s1474_s15, %s1468_s23 }
 0x2a7   : > { %s1867_s24 = scalar_lea.hbm %s1957_s8, %s1110_s11 }
 0x2a8   : > { %p1471_p9 = pneg %p1470_p7  ;;  %p1477_p5 = por %p1476_p1, %p1475_p10 }
 0x2aa   : > { %p1478_p12 = pnand %p1477_p5, %p1471_p9 }
 0x353   : > { %v1154_v15 = vpop.f32.mrf.mxu0 }
 0x355   : > { %v1155_v16 = vpop.f32.mrf.mxu0 }
 0x356   : > { %v1156_v17 = vadd.f32 %v1155_v16, %v1154_v15 }
 0x357   : > { %v1157_v18 = vpop.f32.mrf.mxu0 }
 0x358   : > { %v832_v19 = vadd.f32 %v1156_v17, %v1832_v38 }
 0x359   : > { %v1158_v20 = vpop.f32.mrf.mxu0 }
 0x35a   : > { %v837_v21 = vsub.f32 0.0, %v832_v19 }
 0x35c   : > { %v838_v22 = vmul.f32 1.442695, %v837_v21 }
 0x35e   : > { %1302 = vpow2.f32 %v838_v22 }
 0x36b   : > { %v1303_v23 = vpop.eup %1302 }
 0x36c   : > { %v840_v24 = vadd.f32 1.0, %v1303_v23 }
 0x36e   : > { %1304 = vrcp.f32 %v840_v24 }
 0x37b   : > { %v1305_v26 = vpop.eup %1304 }
 0x37c   : > { %vm843_vm6 = vcmp.gt.f32.partialorder %v1305_v26, %v1101_v25 }
 0x37d   : > { %v844_v27 = vsel %vm843_vm6, 1.0, %v1558_v12 }
 0x37e   : > { %847 = vst [vmem:[%s435_s26] sm:$0xff] %v844_v27 }
 0x37f   : > { %1481 = shalt.err (!%p1478_p12)
}
 0x380   : > { %s1482_s10 = scalar_lea.hbm %s1867_s24, 128  ;;  %s1486_s19 = scalar_lea.hbm %s1957_s8, 256 }
 0x381   : > { %p1483_p0 = scmp.ne.s32.totalorder %s1867_s24, %s1482_s10  ;;  %p1487_p4 = scmp.lt.s32.totalorder %s1867_s24, %s1957_s8 }
 0x382   : > { %p1488_p8 = scmp.lt.s32.totalorder %s1486_s19, %s1482_s10 }
 0x383   : > { %p1484_p3 = pnand %p1483_p0, %p1956_p13 }
 0x384   : > { %p1489_p6 = por %p1488_p8, %p1487_p4 }
 0x385   : > { %p1485_p11 = pneg %p1484_p3 }
 0x387   : > { %p1490_p2 = pnand %p1489_p6, %p1485_p11 }
 0x389   : > { %1493 = shalt.err (!%p1490_p2)
}
 0x38a   : > { %1175 = dma.vmem_to_hbm [thread:$0]  (%p1956_p13), %s882_s5, 128, %s1867_s24, %s854_s14  }
 0x38b PF: > { %s1958_s1 = sld [smem:[#allocation19_spill]]  ;;  %p1961_p9 = scmp.ge.s32.totalorder %s1544_s30, 2 }
 0x38c   : > { %s1959_s25 = sld [smem:[#allocation22_spill]] }
 0x391   : > { %s893_s18 = sand.u32 1, %s1958_s1  }
 0x392   : > { %p1960_p7 = scmp.ne.s32.totalorder %s1959_s25, 0  ;;  %s894_s12 = scalar_lea.sflag [#allocation4], %s893_s18 }
 0x394   : > { %p1196_p10 = pnand %p1961_p9, %p1960_p7 }
 0x396   : > { %p1197_p1 = pneg %p1196_p10 }
 0x398   : > { %1523 = dma.done.wait (%p1197_p1), %s894_s12, 256  }
 0x399   : > { %1525 = vsyncadd (%p1197_p1), %s894_s12, 4294967040  ;;  %s903_s11 = scalar_lea.sflag [#allocation13], %s893_s18 }
 0x39a   : > { %1527 = dma.done.wait (%p1197_p1), %s903_s11, 128  }
 0x39b   : > { %1529 = vsyncadd (%p1197_p1), %s903_s11, 4294967168  ;;  %s1962_s30 = sld [smem:[#allocation20_spill]]  ;;  %s1964_s27 = smov %s1536_s28 }
 0x39c   : > { %s1963_s17 = sld [smem:[#allocation21_spill]]  ;;  %s1965_s28 = smov %s1540_s29 }
 0x3a1   : > { %p29_p13 = scmp.ge.s32.totalorder %s1962_s30, 4  }
 0x3a2   : > { %s1966_s29 = smov %s1963_s17 }
 0x3a3   :  { %31 = sbr.rel (!%p29_p13) target bundleno = 15 (0xf), region = 143 }
 0x3a8   :  { %908 = vsyncpa [#allocation3], 1 }
 0x3a9   :  { %910 = vsyncpa [#allocation3 + $0x1], 1 }
 0x3aa   :  { %911 = vsyncpa [#allocation6], 1 }
 0x3ab   :  { %912 = vsyncpa [#allocation9], 1 }
 0x3ac   :  { %914 = vsyncpa [#allocation9 + $0x1], 1 }
 0x3ad   :  { %915 = vsyncpa [#allocation4], 1 }
 0x3ae   :  { %917 = vsyncpa [#allocation4 + $0x1], 1 }
 0x3af   :  { %918 = vsyncpa [#allocation13], 1 }
 0x3b0   :  { %920 = vsyncpa [#allocation13 + $0x1], 1 }

</bundles_post_ra>
